<compile_context>
chip_gen: v7x
topology: tpu7x:2x2x1
jax: 0.10.0
libtpu: 0.0.40
codegen_flags: <defaults>
</compile_context>

<pallas_src>
import functools

import jax
import jax.numpy as jnp
from jax.experimental import pallas as pl
from jax.experimental.pallas import tpu as pltpu

LANE = 128


def _encoder_kernel(x_ref, w_ref, b_ref, o_ref, *, activation):
    # x_ref: (TM, K)   w_ref: (K, N)   b_ref: (1, N) f32   o_ref: (TM, N)
    y = jnp.dot(x_ref[...], w_ref[...], preferred_element_type=jnp.float32)
    y = y + b_ref[...]                      # bias already f32; broadcast over rows
    o_ref[...] = activation(y).astype(o_ref.dtype)


def _pick_tile_rows(M, K, N, itemsize, *, vmem_budget=24 * 1024 * 1024, cap=4096):
    """Largest multiple-of-8 row tile that fits the VMEM budget, capped at `cap`.

    When M fits in a single tile we use one full-extent block (always a legal
    BlockSpec) - no forced split: on 1-TC chips it only adds a ~0.35us step,
    and the working set here is a few MB vs >=64 MiB of VMEM.
    """
    per_row = 2 * (K + N) * itemsize        # double-buffered x & out tiles
    fixed = K * N * itemsize + N * 4        # single-buffered weight + f32 bias
    avail = max(vmem_budget - fixed, 8 * per_row)
    fit = max(8, (avail // per_row) // 8 * 8)
    tile = int(min(cap, fit))
    if M <= tile:
        return M, 1                         # single step, full-dim block
    tile = (tile // 8) * 8
    return tile, pl.cdiv(M, tile)


def first_encoder(x, weight, bias, activation=None):
    """y = activation(x @ weight.T + bias), matching nn.Linear semantics.

    x:      (B, in_features)
    weight: (f_c, in_features)   -- PyTorch nn.Linear layout
    bias:   (f_c,)
    activation: elementwise callable applied inside the kernel (default ReLU).
    """
    if activation is None:
        activation = lambda y: jnp.maximum(y, 0.0)

    B, in_f = x.shape
    f_c, in_w = weight.shape
    assert in_w == in_f and bias.shape == (f_c,)

    wt = weight.T                            # (in_f, f_c): lane-dense (K, N) layout
    b_f32 = bias.astype(jnp.float32)

    # Lane-pack P batch rows per 128-lane slab when possible (free reshapes).
    pack = LANE // in_f if (in_f < LANE and LANE % in_f == 0) else 1
    if pack > 1 and B % pack == 0:
        M = B // pack
        K = pack * in_f                      # == 128
        N = pack * f_c
        x2 = x.reshape(M, K)                              # free row-major reshape
        w2 = jnp.kron(jnp.eye(pack, dtype=wt.dtype), wt)  # one-time block-diag (K, N)
        b2 = jnp.tile(b_f32, pack).reshape(1, N)
    else:
        pack = 1
        M, K, N = B, in_f, f_c
        x2, w2, b2 = x, wt, b_f32.reshape(1, N)

    itemsize = jnp.dtype(x.dtype).itemsize
    tile_m, grid_m = _pick_tile_rows(M, K, N, itemsize)

    kernel = functools.partial(_encoder_kernel, activation=activation)

    cost = pl.CostEstimate(
        flops=2 * grid_m * tile_m * K * N,
        transcendentals=0,
        bytes_accessed=(x2.size + w2.size) * itemsize + b2.size * 4
        + M * N * itemsize,
    )

    out = pl.pallas_call(
        kernel,
        out_shape=jax.ShapeDtypeStruct((M, N), x.dtype),
        grid_spec=pltpu.PrefetchScalarGridSpec(
            num_scalar_prefetch=0,
            grid=(grid_m,),
            in_specs=[
                # Activations stream over packed batch rows (double-buffered by
                # the BlockSpec pipeliner); ragged last block handled by Pallas
                # (padded reads, masked writes) -- no wrapper-side jnp.pad.
                pl.BlockSpec((tile_m, K), lambda i: (i, 0)),
                # Grid-invariant weight / bias: single-buffered.
                pl.BlockSpec((K, N), lambda i: (0, 0),
                             pipeline_mode=pl.Buffered(1)),
                pl.BlockSpec((1, N), lambda i: (0, 0),
                             pipeline_mode=pl.Buffered(1)),
            ],
            out_specs=pl.BlockSpec((tile_m, N), lambda i: (i, 0)),
        ),
        compiler_params=pltpu.CompilerParams(
            # Batch-row tiles shard across v7x's 2 TensorCores when grid_m > 1.
            dimension_semantics=("parallel",),
        ),
        cost_estimate=cost,
    )(x2, w2, b2)

    if pack > 1:
        out = out.reshape(B, f_c)            # free row-major reshape back
    return out

# TODO(synk): at K=32/f_c=32 this op is launch/DMA-overhead dominated on every
# TPU generation; in a real model it should be fused into the producer or the
# next encoder stage rather than run as a standalone pallas_call.


if __name__ == "__main__":
    # Module hyperparameters.
    W_s, C, f_c = 8, 4, 32                   # in_features = W_s * C = 32
    in_features = W_s * C
    B = 256

    key = jax.random.PRNGKey(0)
    kx, kw, kb = jax.random.split(key, 3)

    x = jax.random.normal(kx, (B, in_features), dtype=jnp.float32)

    # nn.Linear-style uniform init.
    bound = 1.0 / jnp.sqrt(in_features)
    weight = jax.random.uniform(kw, (f_c, in_features), dtype=jnp.float32,
                                minval=-bound, maxval=bound)
    bias = jax.random.uniform(kb, (f_c,), dtype=jnp.float32,
                              minval=-bound, maxval=bound)

    # Default activation (ReLU), jitted: exercises the lane-packed path.
    fe = jax.jit(first_encoder)
    out = jax.block_until_ready(fe(x, weight, bias))
    ref = jnp.maximum(x @ weight.T + bias, 0.0)
    assert out.shape == (B, f_c)
    assert jnp.allclose(out, ref, atol=1e-5, rtol=1e-5)

    # Ragged batch (not a multiple of the pack factor) + non-default activation:
    # exercises the exact-shape fallback path (no padding, no slice copy).
    x2 = jax.random.normal(kb, (10, in_features), dtype=jnp.float32)
    out2 = jax.block_until_ready(first_encoder(x2, weight, bias, jnp.tanh))
    ref2 = jnp.tanh(x2 @ weight.T + bias)
    assert out2.shape == (10, f_c)
    assert jnp.allclose(out2, ref2, atol=1e-5, rtol=1e-5)

    print("KERNEL_OK")
</pallas_src>

<mosaic_0001>
module attributes {stable_mosaic.version = 11 : i64} {
  func.func @_encoder_kernel(%arg0: i32, %arg1: memref<64x128xf32, #tpu.memory_space<vmem>>, %arg2: memref<128x128xf32, #tpu.memory_space<vmem>>, %arg3: memref<1x128xf32, #tpu.memory_space<vmem>>, %arg4: memref<64x128xf32, #tpu.memory_space<vmem>>) attributes {dimension_semantics = [#tpu.dimension_semantics<parallel>], iteration_bounds = array<i64: 1>, scalar_prefetch = 0 : i64, scratch_operands = 0 : i64, tpu.core_type = #tpu.core_type<tc>, window_params = [{transform_indices = @transform_0, window_bounds = array<i64: 64, 128>}, {pipeline_mode = #tpu.pipeline_mode<synchronous>, transform_indices = @transform_1, window_bounds = array<i64: 128, 128>}, {pipeline_mode = #tpu.pipeline_mode<synchronous>, transform_indices = @transform_2, window_bounds = array<i64: 1, 128>}, {transform_indices = @transform_3, window_bounds = array<i64: 64, 128>}]} {
    %c0 = arith.constant 0 : index
    %c0_0 = arith.constant 0 : index
    %0 = vector.load %arg1[%c0, %c0_0] : memref<64x128xf32, #tpu.memory_space<vmem>>, vector<64x128xf32>
    %c0_1 = arith.constant 0 : index
    %c0_2 = arith.constant 0 : index
    %1 = vector.load %arg2[%c0_1, %c0_2] : memref<128x128xf32, #tpu.memory_space<vmem>>, vector<128x128xf32>
    %cst = arith.constant dense<0.000000e+00> : vector<64x128xf32>
    %2 = tpu.matmul %0, %1, %cst {dimension_numbers = #tpu.dot_dimension_numbers<[1], [0], [0], [1], [0, 0, 1, 1], [], []>} : vector<64x128xf32>, vector<128x128xf32>, vector<64x128xf32> -> vector<64x128xf32>
    %c0_3 = arith.constant 0 : index
    %c0_4 = arith.constant 0 : index
    %3 = vector.load %arg3[%c0_3, %c0_4] : memref<1x128xf32, #tpu.memory_space<vmem>>, vector<1x128xf32>
    %4 = vector.broadcast %3 : vector<1x128xf32> to vector<64x128xf32>
    %5 = arith.addf %2, %4 : vector<64x128xf32>
    %cst_5 = arith.constant 0.000000e+00 : f32
    %6 = vector.broadcast %cst_5 : f32 to vector<64x128xf32>
    %7 = arith.maximumf %5, %6 : vector<64x128xf32>
    %c0_6 = arith.constant 0 : index
    %c0_7 = arith.constant 0 : index
    %8 = vector.load %arg4[%c0_6, %c0_7] : memref<64x128xf32, #tpu.memory_space<vmem>>, vector<64x128xf32>
    tpu.vector_store %arg4[%c0_6, %c0_7], %7 {strides = array<i32>} : memref<64x128xf32, #tpu.memory_space<vmem>>, vector<64x128xf32>,
    return
  }
  func.func @transform_0(%arg0: i32) -> (i32, i32) {
    %c0_i32 = arith.constant 0 : i32
    %c0_i32_0 = arith.constant 0 : i32
    return %arg0, %c0_i32 : i32, i32
  }
  func.func @transform_1(%arg0: i32) -> (i32, i32) {
    %c0_i32 = arith.constant 0 : i32
    %c0_i32_0 = arith.constant 0 : i32
    %c0_i32_1 = arith.constant 0 : i32
    return %c0_i32, %c0_i32_0 : i32, i32
  }
  func.func @transform_2(%arg0: i32) -> (i32, i32) {
    %c0_i32 = arith.constant 0 : i32
    %c0_i32_0 = arith.constant 0 : i32
    %c0_i32_1 = arith.constant 0 : i32
    return %c0_i32, %c0_i32_0 : i32, i32
  }
  func.func @transform_3(%arg0: i32) -> (i32, i32) {
    %c0_i32 = arith.constant 0 : i32
    %c0_i32_0 = arith.constant 0 : i32
    return %arg0, %c0_i32 : i32, i32
  }
}

</mosaic_0001>

<bundles_post_ra>
// kernel: tile.8
= control target key start
LH: loop header
LB: loop body
LE: loop exit
PB: predicated region body
PF: predicated region fallthrough
CT: control target
= control target key end

     0   :  { %s22_s0 = inlined_call_operand.vmem [shape: f32[32], index: 0, kind: input, shape index: {}]   ;;  %s23_s1 = inlined_call_operand.vmem [shape: f32[4,32], index: 1, kind: output, shape index: {}]  }
   0x1   :  { %v4_v0 = vld [vmem:[%s22_s0] ss:$0 sm:$0xff] }
   0x2   :  { %5 = vst [vmem:[%s23_s1] sm:$0xf] %v4_v0 }

// kernel: tile.9
= control target key start
LH: loop header
LB: loop body
LE: loop exit
PB: predicated region body
PF: predicated region fallthrough
CT: control target
= control target key end

     0   :  { %vm7_vm0 = vcmask 261120   ;;  %s37_s8 = smov 32   ;;  %s38_s9 = smov 64   ;;  %vm13_vm1 = vcmask 1048320   ;;  %vm19_vm2 = vcmask 785920   ;;  %vm25_vm3 = vcmask 523520   ;;  %s55_s0 = inlined_call_operand.vmem [shape: f32[4,32], index: 0, kind: input, shape index: {}]   ;;  %s56_s1 = inlined_call_operand.vmem [shape: f32[1,128], index: 1, kind: output, shape index: {}]  }
   0x1   :  { %v4_v0 = vld [vmem:[%s55_s0] sm:$0xf]  ;;  %s36_s0 = smov 96  }
   0x2   :  { %5 = vst [vmem:[#allocation1] sm:$0xf] %v4_v0 }
   0x9   :  { %v10_v1 = vld [vmem:[#allocation1 + $0x3] sm:$0x1]   ;;  %v22_v2 = vld [vmem:[#allocation1 + $0x1] sm:$0x1]   ;;  %v6_v3 = vld [vmem:[#allocation1] sm:$0x1]  }
   0xa   :  { %11 = vrot.lane.b32.xlu0 %v10_v1, %s36_s0  ;;  %23 = vrot.lane.b32.xlu1 %v22_v2, %s37_s8  ;;  %v16_v4 = vld [vmem:[#allocation1 + $0x2] sm:$0x1]   ;;  %8 = vst.msk [vmem:[#allocation0] sm:$0x1] %vm7_vm0, %v6_v3  }
   0xe   :  { %17 = vrot.lane.b32.xlu0 %v16_v4, %s38_s9 }
  0x7c   :  { %v12_v5 = vpop.permute.xlu0 %11   ;;  %v24_v6 = vpop.permute.xlu1 %23  }
  0x7d   :  { %14 = vst.msk [vmem:[#allocation0] sm:$0x1] %vm13_vm1, %v12_v5  }
  0x80   :  { %v18_v7 = vpop.permute.xlu0 %17  }
  0x81   :  { %20 = vst.msk [vmem:[#allocation0] sm:$0x1] %vm19_vm2, %v18_v7  }
  0x82   :  { %26 = vst.msk [vmem:[#allocation0] sm:$0x1] %vm25_vm3, %v24_v6  }
  0x89   :  { %v30_v8 = vld [vmem:[#allocation0] sm:$0x1] }
  0x8a   :  { %32 = vst [vmem:[%s56_s1] sm:$0x1] %v30_v8 }

// kernel: first_encoder.1
= control target key start
LH: loop header
LB: loop body
LE: loop exit
PB: predicated region body
PF: predicated region fallthrough
CT: control target
= control target key end

     0   :  { %s406_s1 = inlined_call_operand.vmem [shape: f32[128,128], index: 1, kind: input, shape index: {}]   ;;  %s407_s0 = inlined_call_operand.vmem [shape: f32[64,128], index: 0, kind: input, shape index: {}]   ;;  %s408_s2 = inlined_call_operand.vmem [shape: f32[1,128], index: 2, kind: input, shape index: {}]   ;;  %s409_s3 = inlined_call_operand.vmem [shape: f32[64,128], index: 3, kind: output, shape index: {}]  }
   0x1   :  { %v22_v0 = vld [vmem:[%s406_s1] sm:$0xff]  ;;  %v23_v1 = vld [vmem:[%s406_s1 + $0x8] sm:$0xff]  ;;  %v24_v2 = vld [vmem:[%s406_s1 + $0x10] sm:$0xff] }
   0x2   :  { %v239_v3 = vpack.c.bf16 %v23_v1, %v22_v0  ;;  %v25_v4 = vld [vmem:[%s406_s1 + $0x18] sm:$0xff]  ;;  %v26_v6 = vld [vmem:[%s406_s1 + $0x20] sm:$0xff]  ;;  %v27_v7 = vld [vmem:[%s406_s1 + $0x28] sm:$0xff] }
   0x3   :  { %v243_v5 = vpack.c.bf16 %v25_v4, %v24_v2  ;;  %v247_v8 = vpack.c.bf16 %v27_v7, %v26_v6  ;;  %v14_v9 = vld [vmem:[%s407_s0] sm:$0xff]  ;;  %v28_v11 = vld [vmem:[%s406_s1 + $0x30] sm:$0xff]  ;;  %v29_v12 = vld [vmem:[%s406_s1 + $0x38] sm:$0xff] }
   0x4   :  { %240 = vmatprep.subr.bf16.mxu0 %v239_v3  ;;  %271 = vmatprep.subr.bf16.mxu1 %v239_v3  ;;  %v18_v10 = vld [vmem:[%s407_s0 + $0x20] sm:$0xff]  ;;  %v251_v13 = vpack.c.bf16 %v29_v12, %v28_v11  ;;  %v31_v15 = vld [vmem:[%s406_s1 + $0x48] sm:$0xff]  ;;  %v32_v17 = vld [vmem:[%s406_s1 + $0x50] sm:$0xff] }
   0x5   :  { %242 = vmatpush3.bf16.msra.mxu0 %v239_v3  ;;  %279 = vmatpush3.bf16.msra.mxu1 %v239_v3  ;;  %v30_v14 = vld [vmem:[%s406_s1 + $0x40] sm:$0xff]  ;;  %v33_v18 = vld [vmem:[%s406_s1 + $0x58] sm:$0xff]  ;;  %v35_v21 = vld [vmem:[%s406_s1 + $0x68] sm:$0xff] }
   0x6   :  { %244 = vmatprep.subr.bf16.mxu0 %v243_v5  ;;  %272 = vmatprep.subr.bf16.mxu1 %v243_v5  ;;  %v255_v16 = vpack.c.bf16 %v31_v15, %v30_v14  ;;  %v259_v19 = vpack.c.bf16 %v33_v18, %v32_v17  ;;  %v34_v20 = vld [vmem:[%s406_s1 + $0x60] sm:$0xff]  ;;  %v36_v23 = vld [vmem:[%s406_s1 + $0x70] sm:$0xff]  ;;  %v37_v24 = vld [vmem:[%s406_s1 + $0x78] sm:$0xff] }
   0x7   :  { %227 = vmatprep.mubr.f32.mxu0 %v14_v9  ;;  %233 = vmatprep.mubr.f32.mxu1 %v18_v10  ;;  %v263_v22 = vpack.c.bf16 %v35_v21, %v34_v20  ;;  %v267_v25 = vpack.c.bf16 %v37_v24, %v36_v23  ;;  %v15_v26 = vld [vmem:[%s407_s0 + $0x8] sm:$0xff]  ;;  %v16_v28 = vld [vmem:[%s407_s0 + $0x10] sm:$0xff]  ;;  %v17_v30 = vld [vmem:[%s407_s0 + $0x18] sm:$0xff] }
   0x8   :  { %v19_v27 = vld [vmem:[%s407_s0 + $0x28] sm:$0xff]  ;;  %v20_v29 = vld [vmem:[%s407_s0 + $0x30] sm:$0xff]  ;;  %v21_v31 = vld [vmem:[%s407_s0 + $0x38] sm:$0xff] }
   0x9   :  { %246 = vmatpush3.bf16.msra.mxu0 %v243_v5  ;;  %280 = vmatpush3.bf16.msra.mxu1 %v243_v5  ;;  %v170_v32 = vld [vmem:[%s408_s2] ss:$0 sm:$0xff] }
   0xa   :  { %248 = vmatprep.subr.bf16.mxu0 %v247_v8  ;;  %273 = vmatprep.subr.bf16.mxu1 %v247_v8 }
   0xd   :  { %250 = vmatpush3.bf16.msra.mxu0 %v247_v8  ;;  %281 = vmatpush3.bf16.msra.mxu1 %v247_v8 }
   0xe   :  { %252 = vmatprep.subr.bf16.mxu0 %v251_v13  ;;  %274 = vmatprep.subr.bf16.mxu1 %v251_v13 }
  0x11   :  { %254 = vmatpush3.bf16.msra.mxu0 %v251_v13  ;;  %282 = vmatpush3.bf16.msra.mxu1 %v251_v13 }
  0x12   :  { %256 = vmatprep.subr.bf16.mxu0 %v255_v16  ;;  %275 = vmatprep.subr.bf16.mxu1 %v255_v16 }
  0x15   :  { %258 = vmatpush3.bf16.msra.mxu0 %v255_v16  ;;  %283 = vmatpush3.bf16.msra.mxu1 %v255_v16 }
  0x16   :  { %260 = vmatprep.subr.bf16.mxu0 %v259_v19  ;;  %276 = vmatprep.subr.bf16.mxu1 %v259_v19 }
  0x19   :  { %262 = vmatpush3.bf16.msra.mxu0 %v259_v19  ;;  %284 = vmatpush3.bf16.msra.mxu1 %v259_v19 }
  0x1a   :  { %264 = vmatprep.subr.bf16.mxu0 %v263_v22  ;;  %277 = vmatprep.subr.bf16.mxu1 %v263_v22 }
  0x1d   :  { %266 = vmatpush3.bf16.msra.mxu0 %v263_v22  ;;  %285 = vmatpush3.bf16.msra.mxu1 %v263_v22 }
  0x1e   :  { %268 = vmatprep.subr.bf16.mxu0 %v267_v25  ;;  %278 = vmatprep.subr.bf16.mxu1 %v267_v25 }
  0x21   :  { %270 = vmatpush3.bf16.msra.mxu0 %v267_v25  ;;  %286 = vmatpush3.bf16.msra.mxu1 %v267_v25 }
  0x24   :  { %228 = vmatmul.mubr.f32.vlgmr.msra.gmra.mrb[0].mxu0 %v15_v26  ;;  %234 = vmatmul.mubr.f32.vlgmr.msra.gmra.mrb[0].mxu1 %v19_v27 }
  0x25   :  { %230 = vmatprep.mubr.f32.mxu0 %v16_v28  ;;  %236 = vmatprep.mubr.f32.mxu1 %v20_v29 }
  0x28   :  { %231 = vmatmul.mubr.f32.gmra.mrb[2].mxu0 %v17_v30  ;;  %237 = vmatmul.mubr.f32.gmra.mrb[2].mxu1 %v21_v31 }
  0xf7   :  { %v229_v33 = vpop.f32.mrb[0].mxu0  ;;  %v235_v34 = vpop.f32.mrb[0].mxu1 }
  0xf8   :  { %v117_v35 = vadd.f32 %v229_v33, %v170_v32  ;;  %v137_v36 = vadd.f32 %v235_v34, %v170_v32  ;;  %v111_v37 = vpop.f32.mrb[1].mxu0  ;;  %v131_v38 = vpop.f32.mrb[1].mxu1 }
  0xf9   :  { %v112_v39 = vadd.f32 %v170_v32, %v111_v37  ;;  %v132_v40 = vadd.f32 %v170_v32, %v131_v38 }
  0xfa   :  { %v151_v41 = vmax.f32 %v117_v35, 0.0  ;;  %v155_v42 = vmax.f32 %v137_v36, 0.0 }
  0xfb   :  { %v150_v43 = vmax.f32 %v112_v39, 0.0  ;;  %v154_v44 = vmax.f32 %v132_v40, 0.0  ;;  %v232_v45 = vpop.f32.mrb[2].mxu0  ;;  %v238_v46 = vpop.f32.mrb[2].mxu1 }
  0xfc   :  { %159 = vst [vmem:[%s409_s3 + $0x8] sm:$0xff] %v151_v41  ;;  %163 = vst [vmem:[%s409_s3 + $0x28] sm:$0xff] %v155_v42  ;;  %v127_v47 = vadd.f32 %v232_v45, %v170_v32  ;;  %v147_v48 = vadd.f32 %v238_v46, %v170_v32  ;;  %v121_v49 = vpop.f32.mrb[3].mxu0  ;;  %v141_v50 = vpop.f32.mrb[3].mxu1 }
  0xfd   :  { %158 = vst [vmem:[%s409_s3] sm:$0xff] %v150_v43  ;;  %162 = vst [vmem:[%s409_s3 + $0x20] sm:$0xff] %v154_v44  ;;  %v122_v51 = vadd.f32 %v170_v32, %v121_v49  ;;  %v142_v52 = vadd.f32 %v170_v32, %v141_v50 }
  0xfe   :  { %v153_v53 = vmax.f32 %v127_v47, 0.0  ;;  %v157_v54 = vmax.f32 %v147_v48, 0.0 }
  0xff   :  { %v152_v55 = vmax.f32 %v122_v51, 0.0  ;;  %v156_v56 = vmax.f32 %v142_v52, 0.0 }
 0x100   :  { %161 = vst [vmem:[%s409_s3 + $0x18] sm:$0xff] %v153_v53  ;;  %165 = vst [vmem:[%s409_s3 + $0x38] sm:$0xff] %v157_v54 }
 0x101   :  { %160 = vst [vmem:[%s409_s3 + $0x10] sm:$0xff] %v152_v55  ;;  %164 = vst [vmem:[%s409_s3 + $0x30] sm:$0xff] %v156_v56 }

</bundles_post_ra>
